<compile_context>
chip_gen: v6e
topology: v6e:2x2x1
jax: 0.10.0
libtpu: 0.0.40
codegen_flags: <defaults>
</compile_context>

<pallas_src>
import numpy as np
import jax
import jax.numpy as jnp
from jax import lax
from jax.experimental import pallas as pl
from jax.experimental.pallas import tpu as pltpu

# Constants playing the role of C.NUM_Q / C.NUM_S / C.MAX_STEP
NUM_Q = 16
NUM_S = 12
MAX_STEP = 8
T = MAX_STEP - 1  # steps used by the loss (index = range(max_step - 1))


def _softplus(x):
    # softplus(x) = max(x,0) + log(1+exp(-|x|)); only exp/log (guaranteed Mosaic lowering).
    return jnp.maximum(x, 0.0) + jnp.log(1.0 + jnp.exp(-jnp.abs(x)))


def _loss_kernel(ps_ref, pq_ref, qsa_ref, p_ref, loss_ref):
    # ps_ref: (NUM_S, T, bt)   raw skill logits, students on lanes
    # pq_ref: (NUM_Q, T, bt)   raw question logits
    # qsa_ref: (3, T, bt)      int32 channels (question_id, skill_id, answer)
    num_s, t, bt = ps_ref.shape
    num_q = pq_ref.shape[0]

    qraw = qsa_ref[0]                      # (T, bt)
    sraw = qsa_ref[1]                      # (T, bt)
    a = qsa_ref[2].astype(jnp.float32)     # (T, bt)

    # torch-style negative indexing wraps (padding id 0 -> index -1 -> last class)
    sid = sraw - 1
    qid = qraw - 1
    sid = jnp.where(sid < 0, sid + num_s, sid)
    qid = jnp.where(qid < 0, qid + num_q, qid)

    # gather RAW logits with an unrolled VPU select over the tiny static class axis
    ps_logit = jnp.zeros((t, bt), jnp.float32)
    for s in range(num_s):
        ps_logit = jnp.where(sid == s, ps_ref[s].astype(jnp.float32), ps_logit)
    pq_logit = jnp.zeros((t, bt), jnp.float32)
    for q in range(num_q):
        pq_logit = jnp.where(qid == q, pq_ref[q].astype(jnp.float32), pq_logit)

    # prediction output (sigmoid only here; loss works on logits directly)
    ps = jax.nn.sigmoid(ps_logit)
    pq = jax.nn.sigmoid(pq_logit)
    p_ref[...] = 0.5 * (ps + pq)

    # truncation: keep steps [0, L) where L-1 is the last step with skill_id > 0
    # (full length if there is none -> reproduces the "no break" path)
    row = lax.broadcasted_iota(jnp.int32, (t, bt), 0)
    last = jnp.max(jnp.where(sraw > 0, row, -1), axis=0, keepdims=True)   # (1, bt)
    length = jnp.where(last >= 0, last + 1, t)
    mask = row < length

    # BCE from logits:  -(a*log(sig(x)) + (1-a)*log(1-sig(x))) = a*softplus(-x) + (1-a)*softplus(x)
    # nn.BCELoss clamps each log term at -100 -> clamp each softplus term at 100.
    def bce_from_logits(x):
        neg_log_p = jnp.minimum(_softplus(-x), 100.0)     # -log(sigmoid(x))
        neg_log_1mp = jnp.minimum(_softplus(x), 100.0)    # -log(1 - sigmoid(x))
        return a * neg_log_p + (1.0 - a) * neg_log_1mp

    bce = bce_from_logits(ps_logit) + bce_from_logits(pq_logit)
    loss_ref[...] = (jnp.sum(jnp.where(mask, bce, 0.0), axis=0, keepdims=True)
                     / length.astype(jnp.float32))


def _pick_tile(B):
    """Students per grid step.  Small B -> one full-array tile (no (8,128) constraint, no
    padding).  Large B -> lane-aligned (multiple of 128) tile sized so the grid has >= 2
    parallel steps (keeps both v7x TensorCores busy); tiles stay tiny in VMEM either way."""
    if B <= 256:
        return B
    half = pl.cdiv(B, 2)
    return min(512, pl.cdiv(half, 128) * 128)


@jax.jit
def _loss_device(p_s, p_q, batch):
    B, t, num_s = p_s.shape
    num_q = p_q.shape[2]

    qsa = batch[:, :, :3].astype(jnp.int32)
    qsa_l = jnp.transpose(qsa[:, 1:, :], (2, 1, 0))       # (3, T, B) — students on lanes

    # Lane-dense relayout with the class axis leading (cheap one-time XLA transpose).
    # TODO(synk): in a full pipeline the model should emit logits already in (C, T, B)
    # layout so this relayout copy disappears entirely.
    p_s_l = jnp.transpose(p_s, (2, 1, 0))                  # (NUM_S, T, B)
    p_q_l = jnp.transpose(p_q, (2, 1, 0))                  # (NUM_Q, T, B)

    bt = _pick_tile(B)
    num_tiles = pl.cdiv(B, bt)
    b_pad = num_tiles * bt
    if b_pad != B:
        # TODO(synk): a ragged last tile (in-kernel lane mask) would avoid this pad copy;
        # it only triggers for large B that is not a multiple of the 128-aligned tile.
        pad = b_pad - B
        p_s_l = jnp.pad(p_s_l, ((0, 0), (0, 0), (0, pad)))
        p_q_l = jnp.pad(p_q_l, ((0, 0), (0, 0), (0, pad)))
        qsa_l = jnp.pad(qsa_l, ((0, 0), (0, 0), (0, pad)))

    grid_spec = pltpu.PrefetchScalarGridSpec(
        num_scalar_prefetch=0,
        grid=(num_tiles,),
        in_specs=[
            pl.BlockSpec((num_s, t, bt), lambda i: (0, 0, i)),
            pl.BlockSpec((num_q, t, bt), lambda i: (0, 0, i)),
            pl.BlockSpec((3, t, bt), lambda i: (0, 0, i)),
        ],
        out_specs=(
            pl.BlockSpec((t, bt), lambda i: (0, i)),        # predictions, students on lanes
            pl.BlockSpec((1, bt), lambda i: (0, i)),        # per-student loss, lane-dense
        ),
    )
    p_t, loss_row = pl.pallas_call(
        _loss_kernel,
        out_shape=(jax.ShapeDtypeStruct((t, b_pad), jnp.float32),
                   jax.ShapeDtypeStruct((1, b_pad), jnp.float32)),
        grid_spec=grid_spec,
        compiler_params=pltpu.CompilerParams(dimension_semantics=("parallel",)),
    )(p_s_l, p_q_l, qsa_l)

    # sum per-student losses once (no serial in-kernel accumulator)
    loss = jnp.sum(loss_row[0, :B]).reshape(1)
    p_bt = jnp.transpose(p_t[:, :B])                       # (B, T)

    # per-student truncated lengths and answers (pure functions of `batch`)
    sval = qsa[:, 1:, 1]
    ans = qsa[:, 1:, 2].astype(jnp.float32)
    t_idx = jnp.arange(t, dtype=jnp.int32)[None, :]
    last = jnp.max(jnp.where(sval > 0, t_idx, -1), axis=1)
    lens = jnp.where(last >= 0, last + 1, t).astype(jnp.int32)   # (B,)
    return loss, p_bt, ans, lens


def loss_func_forward(p_s, p_q, batch):
    """Pallas equivalent of lossFunc.forward. Returns (loss[1], prediction, ground_truth)."""
    loss, p_bt, ans, lens = _loss_device(p_s, p_q, batch)
    # TODO(synk): the torch.cat of ragged per-student prefixes has a data-dependent output
    # length, so the final compaction happens on the host (a row-major boolean mask is
    # exactly the ordered concat of per-student prefixes); the device path stays sync-free.
    p_np, a_np, lens_np = np.asarray(p_bt), np.asarray(ans), np.asarray(lens)
    keep = np.arange(p_np.shape[1])[None, :] < lens_np[:, None]
    prediction = jnp.asarray(p_np[keep].astype(np.float32))
    ground_truth = jnp.asarray(a_np[keep].astype(np.float32))
    return loss, prediction, ground_truth


def _reference(p_s, p_q, batch, max_step=MAX_STEP):
    """NumPy port of the PyTorch forward (for verification)."""
    p_s = np.asarray(p_s); p_q = np.asarray(p_q); batch = np.asarray(batch)
    sig = lambda x: 1.0 / (1.0 + np.exp(-x))
    pred_s, pred_q = sig(p_s), sig(p_q)
    qsa = batch[:, :, :3].astype(np.int64)
    T_ = max_step - 1
    loss = np.float32(0.0)
    preds, gts = [], []
    for student in range(batch.shape[0]):
        s_index = qsa[student, 1:, 1] - 1
        q_index = qsa[student, 1:, 0] - 1
        ps = pred_s[student, np.arange(T_), s_index]
        pq = pred_q[student, np.arange(T_), q_index]
        p = (pq + ps) / 2
        s = qsa[student, 1:, 1]
        a = qsa[student, 1:, 2].astype(np.float32)
        for i in range(max_step - 2, -1, -1):
            if s[i] > 0:
                p, ps, pq, a = p[: i + 1], ps[: i + 1], pq[: i + 1], a[: i + 1]
                break
        bce = lambda x, y: np.mean(-(y * np.maximum(np.log(x), -100.0)
                                     + (1 - y) * np.maximum(np.log(1 - x), -100.0)))
        loss = loss + np.float32(bce(ps, a) + bce(pq, a))
        preds.append(p); gts.append(a)
    return (np.array([loss], dtype=np.float32),
            np.concatenate(preds).astype(np.float32),
            np.concatenate(gts).astype(np.float32))


if __name__ == "__main__":
    B = 4
    key = jax.random.PRNGKey(0)
    k1, k2, k3, k4, k5 = jax.random.split(key, 5)

    p_s = jax.random.normal(k1, (B, T, NUM_S), jnp.float32)
    p_q = jax.random.normal(k2, (B, T, NUM_Q), jnp.float32)

    q_ids = jax.random.randint(k3, (B, MAX_STEP), 1, NUM_Q + 1)
    s_ids = jax.random.randint(k4, (B, MAX_STEP), 1, NUM_S + 1)
    answers = jax.random.randint(k5, (B, MAX_STEP), 0, 2)
    # per-student valid lengths (0-padding at the end, like real KT batches)
    valid_lens = jnp.array([MAX_STEP, 6, 4, MAX_STEP - 1])
    valid = jnp.arange(MAX_STEP)[None, :] < valid_lens[:, None]
    q_ids = jnp.where(valid, q_ids, 0)
    s_ids = jnp.where(valid, s_ids, 0)
    answers = jnp.where(valid, answers, 0)
    batch = jnp.stack([q_ids, s_ids, answers], axis=-1).astype(jnp.float32)

    loss, prediction, ground_truth = loss_func_forward(p_s, p_q, batch)
    jax.block_until_ready(loss)
    jax.block_until_ready(prediction)
    jax.block_until_ready(ground_truth)

    ref_loss, ref_pred, ref_gt = _reference(p_s, p_q, batch)
    np.testing.assert_allclose(np.asarray(loss), ref_loss, rtol=2e-3, atol=2e-3)
    np.testing.assert_allclose(np.asarray(prediction), ref_pred, rtol=2e-3, atol=2e-3)
    np.testing.assert_allclose(np.asarray(ground_truth), ref_gt, rtol=0, atol=0)

    print("KERNEL_OK")
</pallas_src>

<mosaic_0001>
module attributes {stable_mosaic.version = 11 : i64} {
  func.func @_loss_kernel(%arg0: i32, %arg1: memref<12x7x4xf32, #tpu.memory_space<vmem>>, %arg2: memref<16x7x4xf32, #tpu.memory_space<vmem>>, %arg3: memref<3x7x4xi32, #tpu.memory_space<vmem>>, %arg4: memref<7x4xf32, #tpu.memory_space<vmem>>, %arg5: memref<1x4xf32, #tpu.memory_space<vmem>>) attributes {dimension_semantics = [#tpu.dimension_semantics<parallel>], iteration_bounds = array<i64: 1>, scalar_prefetch = 0 : i64, scratch_operands = 0 : i64, tpu.core_type = #tpu.core_type<tc>, window_params = [{transform_indices = @transform_0, window_bounds = array<i64: 12, 7, 4>}, {transform_indices = @transform_1, window_bounds = array<i64: 16, 7, 4>}, {transform_indices = @transform_2, window_bounds = array<i64: 3, 7, 4>}, {transform_indices = @transform_3, window_bounds = array<i64: 7, 4>}, {transform_indices = @transform_4, window_bounds = array<i64: 1, 4>}]} {
    %c0 = arith.constant 0 : index
    %c0_0 = arith.constant 0 : index
    %c0_1 = arith.constant 0 : index
    %0 = vector.load %arg3[%c0, %c0_0, %c0_1] : memref<3x7x4xi32, #tpu.memory_space<vmem>>, vector<1x7x4xi32>
    %1 = vector.shape_cast %0 : vector<1x7x4xi32> to vector<7x4xi32>
    %c1 = arith.constant 1 : index
    %c0_2 = arith.constant 0 : index
    %c0_3 = arith.constant 0 : index
    %2 = vector.load %arg3[%c1, %c0_2, %c0_3] : memref<3x7x4xi32, #tpu.memory_space<vmem>>, vector<1x7x4xi32>
    %3 = vector.shape_cast %2 : vector<1x7x4xi32> to vector<7x4xi32>
    %c2 = arith.constant 2 : index
    %c0_4 = arith.constant 0 : index
    %c0_5 = arith.constant 0 : index
    %4 = vector.load %arg3[%c2, %c0_4, %c0_5] : memref<3x7x4xi32, #tpu.memory_space<vmem>>, vector<1x7x4xi32>
    %5 = vector.shape_cast %4 : vector<1x7x4xi32> to vector<7x4xi32>
    %6 = arith.sitofp %5 : vector<7x4xi32> to vector<7x4xf32>
    %c1_i32 = arith.constant 1 : i32
    %7 = vector.broadcast %c1_i32 : i32 to vector<7x4xi32>
    %8 = arith.subi %3, %7 : vector<7x4xi32>
    %c1_i32_6 = arith.constant 1 : i32
    %9 = vector.broadcast %c1_i32_6 : i32 to vector<7x4xi32>
    %10 = arith.subi %1, %9 : vector<7x4xi32>
    %c0_i32 = arith.constant 0 : i32
    %11 = vector.broadcast %c0_i32 : i32 to vector<7x4xi32>
    %12 = arith.cmpi slt, %8, %11 : vector<7x4xi32>
    %c12_i32 = arith.constant 12 : i32
    %13 = vector.broadcast %c12_i32 : i32 to vector<7x4xi32>
    %14 = arith.addi %8, %13 : vector<7x4xi32>
    %15 = arith.select %12, %14, %8 : vector<7x4xi1>, vector<7x4xi32>
    %c0_i32_7 = arith.constant 0 : i32
    %16 = vector.broadcast %c0_i32_7 : i32 to vector<7x4xi32>
    %17 = arith.cmpi slt, %10, %16 : vector<7x4xi32>
    %c16_i32 = arith.constant 16 : i32
    %18 = vector.broadcast %c16_i32 : i32 to vector<7x4xi32>
    %19 = arith.addi %10, %18 : vector<7x4xi32>
    %20 = arith.select %17, %19, %10 : vector<7x4xi1>, vector<7x4xi32>
    %cst = arith.constant 0.000000e+00 : f32
    %21 = vector.broadcast %cst : f32 to vector<7x4xf32>
    %c0_i32_8 = arith.constant 0 : i32
    %22 = vector.broadcast %c0_i32_8 : i32 to vector<7x4xi32>
    %23 = arith.cmpi eq, %15, %22 : vector<7x4xi32>
    %c0_9 = arith.constant 0 : index
    %c0_10 = arith.constant 0 : index
    %c0_11 = arith.constant 0 : index
    %24 = vector.load %arg1[%c0_9, %c0_10, %c0_11] : memref<12x7x4xf32, #tpu.memory_space<vmem>>, vector<1x7x4xf32>
    %25 = vector.shape_cast %24 : vector<1x7x4xf32> to vector<7x4xf32>
    %26 = arith.select %23, %25, %21 : vector<7x4xi1>, vector<7x4xf32>
    %c1_i32_12 = arith.constant 1 : i32
    %27 = vector.broadcast %c1_i32_12 : i32 to vector<7x4xi32>
    %28 = arith.cmpi eq, %15, %27 : vector<7x4xi32>
    %c1_13 = arith.constant 1 : index
    %c0_14 = arith.constant 0 : index
    %c0_15 = arith.constant 0 : index
    %29 = vector.load %arg1[%c1_13, %c0_14, %c0_15] : memref<12x7x4xf32, #tpu.memory_space<vmem>>, vector<1x7x4xf32>
    %30 = vector.shape_cast %29 : vector<1x7x4xf32> to vector<7x4xf32>
    %31 = arith.select %28, %30, %26 : vector<7x4xi1>, vector<7x4xf32>
    %c2_i32 = arith.constant 2 : i32
    %32 = vector.broadcast %c2_i32 : i32 to vector<7x4xi32>
    %33 = arith.cmpi eq, %15, %32 : vector<7x4xi32>
    %c2_16 = arith.constant 2 : index
    %c0_17 = arith.constant 0 : index
    %c0_18 = arith.constant 0 : index
    %34 = vector.load %arg1[%c2_16, %c0_17, %c0_18] : memref<12x7x4xf32, #tpu.memory_space<vmem>>, vector<1x7x4xf32>
    %35 = vector.shape_cast %34 : vector<1x7x4xf32> to vector<7x4xf32>
    %36 = arith.select %33, %35, %31 : vector<7x4xi1>, vector<7x4xf32>
    %c3_i32 = arith.constant 3 : i32
    %37 = vector.broadcast %c3_i32 : i32 to vector<7x4xi32>
    %38 = arith.cmpi eq, %15, %37 : vector<7x4xi32>
    %c3 = arith.constant 3 : index
    %c0_19 = arith.constant 0 : index
    %c0_20 = arith.constant 0 : index
    %39 = vector.load %arg1[%c3, %c0_19, %c0_20] : memref<12x7x4xf32, #tpu.memory_space<vmem>>, vector<1x7x4xf32>
    %40 = vector.shape_cast %39 : vector<1x7x4xf32> to vector<7x4xf32>
    %41 = arith.select %38, %40, %36 : vector<7x4xi1>, vector<7x4xf32>
    %c4_i32 = arith.constant 4 : i32
    %42 = vector.broadcast %c4_i32 : i32 to vector<7x4xi32>
    %43 = arith.cmpi eq, %15, %42 : vector<7x4xi32>
    %c4 = arith.constant 4 : index
    %c0_21 = arith.constant 0 : index
    %c0_22 = arith.constant 0 : index
    %44 = vector.load %arg1[%c4, %c0_21, %c0_22] : memref<12x7x4xf32, #tpu.memory_space<vmem>>, vector<1x7x4xf32>
    %45 = vector.shape_cast %44 : vector<1x7x4xf32> to vector<7x4xf32>
    %46 = arith.select %43, %45, %41 : vector<7x4xi1>, vector<7x4xf32>
    %c5_i32 = arith.constant 5 : i32
    %47 = vector.broadcast %c5_i32 : i32 to vector<7x4xi32>
    %48 = arith.cmpi eq, %15, %47 : vector<7x4xi32>
    %c5 = arith.constant 5 : index
    %c0_23 = arith.constant 0 : index
    %c0_24 = arith.constant 0 : index
    %49 = vector.load %arg1[%c5, %c0_23, %c0_24] : memref<12x7x4xf32, #tpu.memory_space<vmem>>, vector<1x7x4xf32>
    %50 = vector.shape_cast %49 : vector<1x7x4xf32> to vector<7x4xf32>
    %51 = arith.select %48, %50, %46 : vector<7x4xi1>, vector<7x4xf32>
    %c6_i32 = arith.constant 6 : i32
    %52 = vector.broadcast %c6_i32 : i32 to vector<7x4xi32>
    %53 = arith.cmpi eq, %15, %52 : vector<7x4xi32>
    %c6 = arith.constant 6 : index
    %c0_25 = arith.constant 0 : index
    %c0_26 = arith.constant 0 : index
    %54 = vector.load %arg1[%c6, %c0_25, %c0_26] : memref<12x7x4xf32, #tpu.memory_space<vmem>>, vector<1x7x4xf32>
    %55 = vector.shape_cast %54 : vector<1x7x4xf32> to vector<7x4xf32>
    %56 = arith.select %53, %55, %51 : vector<7x4xi1>, vector<7x4xf32>
    %c7_i32 = arith.constant 7 : i32
    %57 = vector.broadcast %c7_i32 : i32 to vector<7x4xi32>
    %58 = arith.cmpi eq, %15, %57 : vector<7x4xi32>
    %c7 = arith.constant 7 : index
    %c0_27 = arith.constant 0 : index
    %c0_28 = arith.constant 0 : index
    %59 = vector.load %arg1[%c7, %c0_27, %c0_28] : memref<12x7x4xf32, #tpu.memory_space<vmem>>, vector<1x7x4xf32>
    %60 = vector.shape_cast %59 : vector<1x7x4xf32> to vector<7x4xf32>
    %61 = arith.select %58, %60, %56 : vector<7x4xi1>, vector<7x4xf32>
    %c8_i32 = arith.constant 8 : i32
    %62 = vector.broadcast %c8_i32 : i32 to vector<7x4xi32>
    %63 = arith.cmpi eq, %15, %62 : vector<7x4xi32>
    %c8 = arith.constant 8 : index
    %c0_29 = arith.constant 0 : index
    %c0_30 = arith.constant 0 : index
    %64 = vector.load %arg1[%c8, %c0_29, %c0_30] : memref<12x7x4xf32, #tpu.memory_space<vmem>>, vector<1x7x4xf32>
    %65 = vector.shape_cast %64 : vector<1x7x4xf32> to vector<7x4xf32>
    %66 = arith.select %63, %65, %61 : vector<7x4xi1>, vector<7x4xf32>
    %c9_i32 = arith.constant 9 : i32
    %67 = vector.broadcast %c9_i32 : i32 to vector<7x4xi32>
    %68 = arith.cmpi eq, %15, %67 : vector<7x4xi32>
    %c9 = arith.constant 9 : index
    %c0_31 = arith.constant 0 : index
    %c0_32 = arith.constant 0 : index
    %69 = vector.load %arg1[%c9, %c0_31, %c0_32] : memref<12x7x4xf32, #tpu.memory_space<vmem>>, vector<1x7x4xf32>
    %70 = vector.shape_cast %69 : vector<1x7x4xf32> to vector<7x4xf32>
    %71 = arith.select %68, %70, %66 : vector<7x4xi1>, vector<7x4xf32>
    %c10_i32 = arith.constant 10 : i32
    %72 = vector.broadcast %c10_i32 : i32 to vector<7x4xi32>
    %73 = arith.cmpi eq, %15, %72 : vector<7x4xi32>
    %c10 = arith.constant 10 : index
    %c0_33 = arith.constant 0 : index
    %c0_34 = arith.constant 0 : index
    %74 = vector.load %arg1[%c10, %c0_33, %c0_34] : memref<12x7x4xf32, #tpu.memory_space<vmem>>, vector<1x7x4xf32>
    %75 = vector.shape_cast %74 : vector<1x7x4xf32> to vector<7x4xf32>
    %76 = arith.select %73, %75, %71 : vector<7x4xi1>, vector<7x4xf32>
    %c11_i32 = arith.constant 11 : i32
    %77 = vector.broadcast %c11_i32 : i32 to vector<7x4xi32>
    %78 = arith.cmpi eq, %15, %77 : vector<7x4xi32>
    %c11 = arith.constant 11 : index
    %c0_35 = arith.constant 0 : index
    %c0_36 = arith.constant 0 : index
    %79 = vector.load %arg1[%c11, %c0_35, %c0_36] : memref<12x7x4xf32, #tpu.memory_space<vmem>>, vector<1x7x4xf32>
    %80 = vector.shape_cast %79 : vector<1x7x4xf32> to vector<7x4xf32>
    %81 = arith.select %78, %80, %76 : vector<7x4xi1>, vector<7x4xf32>
    %cst_37 = arith.constant 0.000000e+00 : f32
    %82 = vector.broadcast %cst_37 : f32 to vector<7x4xf32>
    %c0_i32_38 = arith.constant 0 : i32
    %83 = vector.broadcast %c0_i32_38 : i32 to vector<7x4xi32>
    %84 = arith.cmpi eq, %20, %83 : vector<7x4xi32>
    %c0_39 = arith.constant 0 : index
    %c0_40 = arith.constant 0 : index
    %c0_41 = arith.constant 0 : index
    %85 = vector.load %arg2[%c0_39, %c0_40, %c0_41] : memref<16x7x4xf32, #tpu.memory_space<vmem>>, vector<1x7x4xf32>
    %86 = vector.shape_cast %85 : vector<1x7x4xf32> to vector<7x4xf32>
    %87 = arith.select %84, %86, %82 : vector<7x4xi1>, vector<7x4xf32>
    %c1_i32_42 = arith.constant 1 : i32
    %88 = vector.broadcast %c1_i32_42 : i32 to vector<7x4xi32>
    %89 = arith.cmpi eq, %20, %88 : vector<7x4xi32>
    %c1_43 = arith.constant 1 : index
    %c0_44 = arith.constant 0 : index
    %c0_45 = arith.constant 0 : index
    %90 = vector.load %arg2[%c1_43, %c0_44, %c0_45] : memref<16x7x4xf32, #tpu.memory_space<vmem>>, vector<1x7x4xf32>
    %91 = vector.shape_cast %90 : vector<1x7x4xf32> to vector<7x4xf32>
    %92 = arith.select %89, %91, %87 : vector<7x4xi1>, vector<7x4xf32>
    %c2_i32_46 = arith.constant 2 : i32
    %93 = vector.broadcast %c2_i32_46 : i32 to vector<7x4xi32>
    %94 = arith.cmpi eq, %20, %93 : vector<7x4xi32>
    %c2_47 = arith.constant 2 : index
    %c0_48 = arith.constant 0 : index
    %c0_49 = arith.constant 0 : index
    %95 = vector.load %arg2[%c2_47, %c0_48, %c0_49] : memref<16x7x4xf32, #tpu.memory_space<vmem>>, vector<1x7x4xf32>
    %96 = vector.shape_cast %95 : vector<1x7x4xf32> to vector<7x4xf32>
    %97 = arith.select %94, %96, %92 : vector<7x4xi1>, vector<7x4xf32>
    %c3_i32_50 = arith.constant 3 : i32
    %98 = vector.broadcast %c3_i32_50 : i32 to vector<7x4xi32>
    %99 = arith.cmpi eq, %20, %98 : vector<7x4xi32>
    %c3_51 = arith.constant 3 : index
    %c0_52 = arith.constant 0 : index
    %c0_53 = arith.constant 0 : index
    %100 = vector.load %arg2[%c3_51, %c0_52, %c0_53] : memref<16x7x4xf32, #tpu.memory_space<vmem>>, vector<1x7x4xf32>
    %101 = vector.shape_cast %100 : vector<1x7x4xf32> to vector<7x4xf32>
    %102 = arith.select %99, %101, %97 : vector<7x4xi1>, vector<7x4xf32>
    %c4_i32_54 = arith.constant 4 : i32
    %103 = vector.broadcast %c4_i32_54 : i32 to vector<7x4xi32>
    %104 = arith.cmpi eq, %20, %103 : vector<7x4xi32>
    %c4_55 = arith.constant 4 : index
    %c0_56 = arith.constant 0 : index
    %c0_57 = arith.constant 0 : index
    %105 = vector.load %arg2[%c4_55, %c0_56, %c0_57] : memref<16x7x4xf32, #tpu.memory_space<vmem>>, vector<1x7x4xf32>
    %106 = vector.shape_cast %105 : vector<1x7x4xf32> to vector<7x4xf32>
    %107 = arith.select %104, %106, %102 : vector<7x4xi1>, vector<7x4xf32>
    %c5_i32_58 = arith.constant 5 : i32
    %108 = vector.broadcast %c5_i32_58 : i32 to vector<7x4xi32>
    %109 = arith.cmpi eq, %20, %108 : vector<7x4xi32>
    %c5_59 = arith.constant 5 : index
    %c0_60 = arith.constant 0 : index
    %c0_61 = arith.constant 0 : index
    %110 = vector.load %arg2[%c5_59, %c0_60, %c0_61] : memref<16x7x4xf32, #tpu.memory_space<vmem>>, vector<1x7x4xf32>
    %111 = vector.shape_cast %110 : vector<1x7x4xf32> to vector<7x4xf32>
    %112 = arith.select %109, %111, %107 : vector<7x4xi1>, vector<7x4xf32>
    %c6_i32_62 = arith.constant 6 : i32
    %113 = vector.broadcast %c6_i32_62 : i32 to vector<7x4xi32>
    %114 = arith.cmpi eq, %20, %113 : vector<7x4xi32>
    %c6_63 = arith.constant 6 : index
    %c0_64 = arith.constant 0 : index
    %c0_65 = arith.constant 0 : index
    %115 = vector.load %arg2[%c6_63, %c0_64, %c0_65] : memref<16x7x4xf32, #tpu.memory_space<vmem>>, vector<1x7x4xf32>
    %116 = vector.shape_cast %115 : vector<1x7x4xf32> to vector<7x4xf32>
    %117 = arith.select %114, %116, %112 : vector<7x4xi1>, vector<7x4xf32>
    %c7_i32_66 = arith.constant 7 : i32
    %118 = vector.broadcast %c7_i32_66 : i32 to vector<7x4xi32>
    %119 = arith.cmpi eq, %20, %118 : vector<7x4xi32>
    %c7_67 = arith.constant 7 : index
    %c0_68 = arith.constant 0 : index
    %c0_69 = arith.constant 0 : index
    %120 = vector.load %arg2[%c7_67, %c0_68, %c0_69] : memref<16x7x4xf32, #tpu.memory_space<vmem>>, vector<1x7x4xf32>
    %121 = vector.shape_cast %120 : vector<1x7x4xf32> to vector<7x4xf32>
    %122 = arith.select %119, %121, %117 : vector<7x4xi1>, vector<7x4xf32>
    %c8_i32_70 = arith.constant 8 : i32
    %123 = vector.broadcast %c8_i32_70 : i32 to vector<7x4xi32>
    %124 = arith.cmpi eq, %20, %123 : vector<7x4xi32>
    %c8_71 = arith.constant 8 : index
    %c0_72 = arith.constant 0 : index
    %c0_73 = arith.constant 0 : index
    %125 = vector.load %arg2[%c8_71, %c0_72, %c0_73] : memref<16x7x4xf32, #tpu.memory_space<vmem>>, vector<1x7x4xf32>
    %126 = vector.shape_cast %125 : vector<1x7x4xf32> to vector<7x4xf32>
    %127 = arith.select %124, %126, %122 : vector<7x4xi1>, vector<7x4xf32>
    %c9_i32_74 = arith.constant 9 : i32
    %128 = vector.broadcast %c9_i32_74 : i32 to vector<7x4xi32>
    %129 = arith.cmpi eq, %20, %128 : vector<7x4xi32>
    %c9_75 = arith.constant 9 : index
    %c0_76 = arith.constant 0 : index
    %c0_77 = arith.constant 0 : index
    %130 = vector.load %arg2[%c9_75, %c0_76, %c0_77] : memref<16x7x4xf32, #tpu.memory_space<vmem>>, vector<1x7x4xf32>
    %131 = vector.shape_cast %130 : vector<1x7x4xf32> to vector<7x4xf32>
    %132 = arith.select %129, %131, %127 : vector<7x4xi1>, vector<7x4xf32>
    %c10_i32_78 = arith.constant 10 : i32
    %133 = vector.broadcast %c10_i32_78 : i32 to vector<7x4xi32>
    %134 = arith.cmpi eq, %20, %133 : vector<7x4xi32>
    %c10_79 = arith.constant 10 : index
    %c0_80 = arith.constant 0 : index
    %c0_81 = arith.constant 0 : index
    %135 = vector.load %arg2[%c10_79, %c0_80, %c0_81] : memref<16x7x4xf32, #tpu.memory_space<vmem>>, vector<1x7x4xf32>
    %136 = vector.shape_cast %135 : vector<1x7x4xf32> to vector<7x4xf32>
    %137 = arith.select %134, %136, %132 : vector<7x4xi1>, vector<7x4xf32>
    %c11_i32_82 = arith.constant 11 : i32
    %138 = vector.broadcast %c11_i32_82 : i32 to vector<7x4xi32>
    %139 = arith.cmpi eq, %20, %138 : vector<7x4xi32>
    %c11_83 = arith.constant 11 : index
    %c0_84 = arith.constant 0 : index
    %c0_85 = arith.constant 0 : index
    %140 = vector.load %arg2[%c11_83, %c0_84, %c0_85] : memref<16x7x4xf32, #tpu.memory_space<vmem>>, vector<1x7x4xf32>
    %141 = vector.shape_cast %140 : vector<1x7x4xf32> to vector<7x4xf32>
    %142 = arith.select %139, %141, %137 : vector<7x4xi1>, vector<7x4xf32>
    %c12_i32_86 = arith.constant 12 : i32
    %143 = vector.broadcast %c12_i32_86 : i32 to vector<7x4xi32>
    %144 = arith.cmpi eq, %20, %143 : vector<7x4xi32>
    %c12 = arith.constant 12 : index
    %c0_87 = arith.constant 0 : index
    %c0_88 = arith.constant 0 : index
    %145 = vector.load %arg2[%c12, %c0_87, %c0_88] : memref<16x7x4xf32, #tpu.memory_space<vmem>>, vector<1x7x4xf32>
    %146 = vector.shape_cast %145 : vector<1x7x4xf32> to vector<7x4xf32>
    %147 = arith.select %144, %146, %142 : vector<7x4xi1>, vector<7x4xf32>
    %c13_i32 = arith.constant 13 : i32
    %148 = vector.broadcast %c13_i32 : i32 to vector<7x4xi32>
    %149 = arith.cmpi eq, %20, %148 : vector<7x4xi32>
    %c13 = arith.constant 13 : index
    %c0_89 = arith.constant 0 : index
    %c0_90 = arith.constant 0 : index
    %150 = vector.load %arg2[%c13, %c0_89, %c0_90] : memref<16x7x4xf32, #tpu.memory_space<vmem>>, vector<1x7x4xf32>
    %151 = vector.shape_cast %150 : vector<1x7x4xf32> to vector<7x4xf32>
    %152 = arith.select %149, %151, %147 : vector<7x4xi1>, vector<7x4xf32>
    %c14_i32 = arith.constant 14 : i32
    %153 = vector.broadcast %c14_i32 : i32 to vector<7x4xi32>
    %154 = arith.cmpi eq, %20, %153 : vector<7x4xi32>
    %c14 = arith.constant 14 : index
    %c0_91 = arith.constant 0 : index
    %c0_92 = arith.constant 0 : index
    %155 = vector.load %arg2[%c14, %c0_91, %c0_92] : memref<16x7x4xf32, #tpu.memory_space<vmem>>, vector<1x7x4xf32>
    %156 = vector.shape_cast %155 : vector<1x7x4xf32> to vector<7x4xf32>
    %157 = arith.select %154, %156, %152 : vector<7x4xi1>, vector<7x4xf32>
    %c15_i32 = arith.constant 15 : i32
    %158 = vector.broadcast %c15_i32 : i32 to vector<7x4xi32>
    %159 = arith.cmpi eq, %20, %158 : vector<7x4xi32>
    %c15 = arith.constant 15 : index
    %c0_93 = arith.constant 0 : index
    %c0_94 = arith.constant 0 : index
    %160 = vector.load %arg2[%c15, %c0_93, %c0_94] : memref<16x7x4xf32, #tpu.memory_space<vmem>>, vector<1x7x4xf32>
    %161 = vector.shape_cast %160 : vector<1x7x4xf32> to vector<7x4xf32>
    %162 = arith.select %159, %161, %157 : vector<7x4xi1>, vector<7x4xf32>
    %163 = arith.negf %81 : vector<7x4xf32>
    %164 = math.exp %163 : vector<7x4xf32>
    %cst_95 = arith.constant 1.000000e+00 : f32
    %165 = vector.broadcast %cst_95 : f32 to vector<7x4xf32>
    %166 = arith.addf %165, %164 : vector<7x4xf32>
    %167 = arith.divf %165, %166 : vector<7x4xf32>
    %168 = arith.negf %162 : vector<7x4xf32>
    %169 = math.exp %168 : vector<7x4xf32>
    %cst_96 = arith.constant 1.000000e+00 : f32
    %170 = vector.broadcast %cst_96 : f32 to vector<7x4xf32>
    %171 = arith.addf %170, %169 : vector<7x4xf32>
    %172 = arith.divf %170, %171 : vector<7x4xf32>
    %173 = arith.addf %167, %172 : vector<7x4xf32>
    %cst_97 = arith.constant 5.000000e-01 : f32
    %174 = vector.broadcast %cst_97 : f32 to vector<7x4xf32>
    %175 = arith.mulf %174, %173 : vector<7x4xf32>
    %c0_98 = arith.constant 0 : index
    %c0_99 = arith.constant 0 : index
    %176 = vector.load %arg4[%c0_98, %c0_99] : memref<7x4xf32, #tpu.memory_space<vmem>>, vector<7x4xf32>
    tpu.vector_store %arg4[%c0_98, %c0_99], %175 {strides = array<i32>} : memref<7x4xf32, #tpu.memory_space<vmem>>, vector<7x4xf32>,
    %177 = tpu.iota {dimensions = array<i32: 0>} : vector<7x4xi32>
    %c0_i32_100 = arith.constant 0 : i32
    %178 = vector.broadcast %c0_i32_100 : i32 to vector<7x4xi32>
    %179 = arith.cmpi sgt, %3, %178 : vector<7x4xi32>
    %c-1_i32 = arith.constant -1 : i32
    %180 = vector.broadcast %c-1_i32 : i32 to vector<7x4xi32>
    %181 = arith.select %179, %177, %180 : vector<7x4xi1>, vector<7x4xi32>
    %cst_101 = arith.constant dense<-2147483648> : vector<4xi32>
    %182 = vector.multi_reduction <maxsi>, %181, %cst_101 [0] : vector<7x4xi32> to vector<4xi32>
    %183 = vector.shape_cast %182 : vector<4xi32> to vector<1x4xi32>
    %c0_i32_102 = arith.constant 0 : i32
    %184 = vector.broadcast %c0_i32_102 : i32 to vector<1x4xi32>
    %185 = arith.cmpi sge, %183, %184 : vector<1x4xi32>
    %c1_i32_103 = arith.constant 1 : i32
    %186 = vector.broadcast %c1_i32_103 : i32 to vector<1x4xi32>
    %187 = arith.addi %183, %186 : vector<1x4xi32>
    %c7_i32_104 = arith.constant 7 : i32
    %188 = vector.broadcast %c7_i32_104 : i32 to vector<1x4xi32>
    %189 = arith.select %185, %187, %188 : vector<1x4xi1>, vector<1x4xi32>
    %190 = vector.broadcast %189 : vector<1x4xi32> to vector<7x4xi32>
    %191 = arith.cmpi slt, %177, %190 : vector<7x4xi32>
    %cst_105 = arith.constant 0.000000e+00 : f32
    %192 = vector.broadcast %cst_105 : f32 to vector<7x4xf32>
    %193 = arith.subf %192, %81 : vector<7x4xf32>
    %cst_106 = arith.constant 0.000000e+00 : f32
    %194 = vector.broadcast %cst_106 : f32 to vector<7x4xf32>
    %195 = arith.maximumf %193, %194 : vector<7x4xf32>
    %196 = math.absf %193 : vector<7x4xf32>
    %cst_107 = arith.constant 0.000000e+00 : f32
    %197 = vector.broadcast %cst_107 : f32 to vector<7x4xf32>
    %198 = arith.subf %197, %196 : vector<7x4xf32>
    %199 = math.exp %198 : vector<7x4xf32>
    %cst_108 = arith.constant 1.000000e+00 : f32
    %200 = vector.broadcast %cst_108 : f32 to vector<7x4xf32>
    %201 = arith.addf %200, %199 : vector<7x4xf32>
    %202 = math.log %201 : vector<7x4xf32>
    %203 = arith.addf %195, %202 : vector<7x4xf32>
    %cst_109 = arith.constant 1.000000e+02 : f32
    %204 = vector.broadcast %cst_109 : f32 to vector<7x4xf32>
    %205 = arith.minimumf %203, %204 : vector<7x4xf32>
    %cst_110 = arith.constant 0.000000e+00 : f32
    %206 = vector.broadcast %cst_110 : f32 to vector<7x4xf32>
    %207 = arith.maximumf %81, %206 : vector<7x4xf32>
    %208 = math.absf %81 : vector<7x4xf32>
    %cst_111 = arith.constant 0.000000e+00 : f32
    %209 = vector.broadcast %cst_111 : f32 to vector<7x4xf32>
    %210 = arith.subf %209, %208 : vector<7x4xf32>
    %211 = math.exp %210 : vector<7x4xf32>
    %cst_112 = arith.constant 1.000000e+00 : f32
    %212 = vector.broadcast %cst_112 : f32 to vector<7x4xf32>
    %213 = arith.addf %212, %211 : vector<7x4xf32>
    %214 = math.log %213 : vector<7x4xf32>
    %215 = arith.addf %207, %214 : vector<7x4xf32>
    %cst_113 = arith.constant 1.000000e+02 : f32
    %216 = vector.broadcast %cst_113 : f32 to vector<7x4xf32>
    %217 = arith.minimumf %215, %216 : vector<7x4xf32>
    %218 = arith.mulf %6, %205 : vector<7x4xf32>
    %cst_114 = arith.constant 1.000000e+00 : f32
    %219 = vector.broadcast %cst_114 : f32 to vector<7x4xf32>
    %220 = arith.subf %219, %6 : vector<7x4xf32>
    %221 = arith.mulf %220, %217 : vector<7x4xf32>
    %222 = arith.addf %218, %221 : vector<7x4xf32>
    %cst_115 = arith.constant 0.000000e+00 : f32
    %223 = vector.broadcast %cst_115 : f32 to vector<7x4xf32>
    %224 = arith.subf %223, %162 : vector<7x4xf32>
    %cst_116 = arith.constant 0.000000e+00 : f32
    %225 = vector.broadcast %cst_116 : f32 to vector<7x4xf32>
    %226 = arith.maximumf %224, %225 : vector<7x4xf32>
    %227 = math.absf %224 : vector<7x4xf32>
    %cst_117 = arith.constant 0.000000e+00 : f32
    %228 = vector.broadcast %cst_117 : f32 to vector<7x4xf32>
    %229 = arith.subf %228, %227 : vector<7x4xf32>
    %230 = math.exp %229 : vector<7x4xf32>
    %cst_118 = arith.constant 1.000000e+00 : f32
    %231 = vector.broadcast %cst_118 : f32 to vector<7x4xf32>
    %232 = arith.addf %231, %230 : vector<7x4xf32>
    %233 = math.log %232 : vector<7x4xf32>
    %234 = arith.addf %226, %233 : vector<7x4xf32>
    %cst_119 = arith.constant 1.000000e+02 : f32
    %235 = vector.broadcast %cst_119 : f32 to vector<7x4xf32>
    %236 = arith.minimumf %234, %235 : vector<7x4xf32>
    %cst_120 = arith.constant 0.000000e+00 : f32
    %237 = vector.broadcast %cst_120 : f32 to vector<7x4xf32>
    %238 = arith.maximumf %162, %237 : vector<7x4xf32>
    %239 = math.absf %162 : vector<7x4xf32>
    %cst_121 = arith.constant 0.000000e+00 : f32
    %240 = vector.broadcast %cst_121 : f32 to vector<7x4xf32>
    %241 = arith.subf %240, %239 : vector<7x4xf32>
    %242 = math.exp %241 : vector<7x4xf32>
    %cst_122 = arith.constant 1.000000e+00 : f32
    %243 = vector.broadcast %cst_122 : f32 to vector<7x4xf32>
    %244 = arith.addf %243, %242 : vector<7x4xf32>
    %245 = math.log %244 : vector<7x4xf32>
    %246 = arith.addf %238, %245 : vector<7x4xf32>
    %cst_123 = arith.constant 1.000000e+02 : f32
    %247 = vector.broadcast %cst_123 : f32 to vector<7x4xf32>
    %248 = arith.minimumf %246, %247 : vector<7x4xf32>
    %249 = arith.mulf %6, %236 : vector<7x4xf32>
    %cst_124 = arith.constant 1.000000e+00 : f32
    %250 = vector.broadcast %cst_124 : f32 to vector<7x4xf32>
    %251 = arith.subf %250, %6 : vector<7x4xf32>
    %252 = arith.mulf %251, %248 : vector<7x4xf32>
    %253 = arith.addf %249, %252 : vector<7x4xf32>
    %254 = arith.addf %222, %253 : vector<7x4xf32>
    %cst_125 = arith.constant 0.000000e+00 : f32
    %255 = vector.broadcast %cst_125 : f32 to vector<7x4xf32>
    %256 = arith.select %191, %254, %255 : vector<7x4xi1>, vector<7x4xf32>
    %cst_126 = arith.constant dense<0.000000e+00> : vector<4xf32>
    %257 = vector.multi_reduction <add>, %256, %cst_126 [0] : vector<7x4xf32> to vector<4xf32>
    %258 = vector.shape_cast %257 : vector<4xf32> to vector<1x4xf32>
    %259 = arith.sitofp %189 : vector<1x4xi32> to vector<1x4xf32>
    %260 = arith.divf %258, %259 : vector<1x4xf32>
    %c0_127 = arith.constant 0 : index
    %c0_128 = arith.constant 0 : index
    %261 = vector.load %arg5[%c0_127, %c0_128] : memref<1x4xf32, #tpu.memory_space<vmem>>, vector<1x4xf32>
    tpu.vector_store %arg5[%c0_127, %c0_128], %260 {strides = array<i32>} : memref<1x4xf32, #tpu.memory_space<vmem>>, vector<1x4xf32>,
    return
  }
  func.func @transform_0(%arg0: i32) -> (i32, i32, i32) {
    %c0_i32 = arith.constant 0 : i32
    %c0_i32_0 = arith.constant 0 : i32
    %c0_i32_1 = arith.constant 0 : i32
    return %c0_i32, %c0_i32_0, %arg0 : i32, i32, i32
  }
  func.func @transform_1(%arg0: i32) -> (i32, i32, i32) {
    %c0_i32 = arith.constant 0 : i32
    %c0_i32_0 = arith.constant 0 : i32
    %c0_i32_1 = arith.constant 0 : i32
    return %c0_i32, %c0_i32_0, %arg0 : i32, i32, i32
  }
  func.func @transform_2(%arg0: i32) -> (i32, i32, i32) {
    %c0_i32 = arith.constant 0 : i32
    %c0_i32_0 = arith.constant 0 : i32
    %c0_i32_1 = arith.constant 0 : i32
    return %c0_i32, %c0_i32_0, %arg0 : i32, i32, i32
  }
  func.func @transform_3(%arg0: i32) -> (i32, i32) {
    %c0_i32 = arith.constant 0 : i32
    %c0_i32_0 = arith.constant 0 : i32
    return %c0_i32, %arg0 : i32, i32
  }
  func.func @transform_4(%arg0: i32) -> (i32, i32) {
    %c0_i32 = arith.constant 0 : i32
    %c0_i32_0 = arith.constant 0 : i32
    return %c0_i32, %arg0 : i32, i32
  }
}

</mosaic_0001>

<bundles_post_ra>
// kernel: _loss_device.1
= control target key start
LH: loop header
LB: loop body
LE: loop exit
PB: predicated region body
PF: predicated region fallthrough
CT: control target
= control target key end

     0   :  { %v156_v53 = vlaneseq  ;;  %s500_s2 = inlined_call_operand.vmem [shape: s32[3,7,4], index: 2, kind: input, shape index: {}]   ;;  %s501_s0 = inlined_call_operand.vmem [shape: f32[12,7,4], index: 0, kind: input, shape index: {}]   ;;  %s502_s1 = inlined_call_operand.vmem [shape: f32[16,7,4], index: 1, kind: input, shape index: {}]   ;;  %s503_s3 = inlined_call_operand.vmem [shape: f32[7,4], index: 3, kind: output, shape index: {0}]   ;;  %s504_s4 = inlined_call_operand.vmem [shape: f32[1,4], index: 4, kind: output, shape index: {1}]  }
   0x1   :  { %v16_v0 = vld [vmem:[%s500_s2] sm:$0x7f]  ;;  %v334_v1 = vld [vmem:[%s500_s2 + $0x8] sm:$0x7f]  ;;  %v250_v9 = vld [vmem:[%s501_s0 + $0x10] sm:$0x7f] }
   0x2   :  { %v247_v2 = vadd.s32 4294967295, %v334_v1  ;;  %v248_v3 = vadd.s32 4294967295, %v16_v0  ;;  %v31_v6 = vld [vmem:[%s501_s0] sm:$0x7f]  ;;  %v249_v8 = vld [vmem:[%s501_s0 + $0x8] sm:$0x7f] }
   0x3   :  { %v251_v10 = vld [vmem:[%s501_s0 + $0x18] sm:$0x7f]  ;;  %v252_v12 = vld [vmem:[%s501_s0 + $0x20] sm:$0x7f]  ;;  %v253_v14 = vld [vmem:[%s501_s0 + $0x28] sm:$0x7f] }
   0x4   :  { %vm24_vm0 = vcmp.lt.s32.totalorder %v247_v2, 0  ;;  %v25_v4 = vadd.s32 12, %v247_v2  ;;  %vm27_vm1 = vcmp.lt.s32.totalorder %v248_v3, 0  ;;  %v28_v5 = vadd.s32 16, %v248_v3  ;;  %v78_v15 = vld [vmem:[%s502_s1] sm:$0x7f] }
   0x5   :  { %v254_v17 = vld [vmem:[%s501_s0 + $0x30] sm:$0x7f]  ;;  %v260_v18 = vld [vmem:[%s502_s1 + $0x8] sm:$0x7f]  ;;  %v262_v23 = vld [vmem:[%s502_s1 + $0x18] sm:$0x7f] }
   0x6   :  { %v340_v7 = vsel %vm24_vm0, %v25_v4, %v247_v2  ;;  %v351_v11 = vsel %vm27_vm1, %v28_v5, %v248_v3  ;;  %v261_v20 = vld [vmem:[%s502_s1 + $0x10] sm:$0x7f]  ;;  %v255_v25 = vld [vmem:[%s501_s0 + $0x38] sm:$0x7f]  ;;  %v263_v27 = vld [vmem:[%s502_s1 + $0x20] sm:$0x7f] }
   0x7   :  { %vm30_vm2 = vcmp.eq.s32.totalorder %v340_v7, 0  ;;  %vm33_vm3 = vcmp.eq.s32.totalorder %v340_v7, 1  ;;  %vm37_vm4 = vcmp.eq.s32.totalorder %v340_v7, 2  ;;  %vm41_vm5 = vcmp.eq.s32.totalorder %v340_v7, 3  ;;  %v256_v29 = vld [vmem:[%s501_s0 + $0x40] sm:$0x7f] }
   0x8   :  { %v32_v13 = vsel %vm30_vm2, %v31_v6, 0.0  ;;  %vm45_vm6 = vcmp.eq.s32.totalorder %v340_v7, 4  ;;  %vm49_vm7 = vcmp.eq.s32.totalorder %v340_v7, 5  ;;  %vm53_vm8 = vcmp.eq.s32.totalorder %v340_v7, 6  ;;  %v264_v31 = vld [vmem:[%s502_s1 + $0x28] sm:$0x7f] }
   0x9   :  { %v36_v16 = vsel %vm33_vm3, %v249_v8, %v32_v13  ;;  %vm57_vm9 = vcmp.eq.s32.totalorder %v340_v7, 7  ;;  %vm77_vm10 = vcmp.eq.s32.totalorder %v351_v11, 0  ;;  %vm80_vm11 = vcmp.eq.s32.totalorder %v351_v11, 1  ;;  %v257_v33 = vld [vmem:[%s501_s0 + $0x48] sm:$0x7f] }
   0xa   :  { %v40_v19 = vsel %vm37_vm4, %v250_v9, %v36_v16  ;;  %v79_v22 = vsel %vm77_vm10, %v78_v15, 0.0  ;;  %vm84_vm12 = vcmp.eq.s32.totalorder %v351_v11, 2  ;;  %vm88_vm13 = vcmp.eq.s32.totalorder %v351_v11, 3  ;;  %v265_v35 = vld [vmem:[%s502_s1 + $0x30] sm:$0x7f] }
   0xb   :  { %v44_v21 = vsel %vm41_vm5, %v251_v10, %v40_v19  ;;  %v83_v26 = vsel %vm80_vm11, %v260_v18, %v79_v22  ;;  %vm92_vm14 = vcmp.eq.s32.totalorder %v351_v11, 4  ;;  %vm61_vm15 = vcmp.eq.s32.totalorder %v340_v7, 8  ;;  %v258_v37 = vld [vmem:[%s501_s0 + $0x50] sm:$0x7f]  ;;  %v266_v39 = vld [vmem:[%s502_s1 + $0x38] sm:$0x7f] }
   0xc   :  { %v48_v24 = vsel %vm45_vm6, %v252_v12, %v44_v21  ;;  %v87_v30 = vsel %vm84_vm12, %v261_v20, %v83_v26  ;;  %vm96_vm0 = vcmp.eq.s32.totalorder %v351_v11, 5  ;;  %vm65_vm1 = vcmp.eq.s32.totalorder %v340_v7, 9  ;;  %v259_v41 = vld [vmem:[%s501_s0 + $0x58] sm:$0x7f]  ;;  %v267_v43 = vld [vmem:[%s502_s1 + $0x40] sm:$0x7f] }
   0xd   :  { %v52_v28 = vsel %vm49_vm7, %v253_v14, %v48_v24  ;;  %v91_v34 = vsel %vm88_vm13, %v262_v23, %v87_v30  ;;  %vm100_vm2 = vcmp.eq.s32.totalorder %v351_v11, 6  ;;  %vm69_vm3 = vcmp.eq.s32.totalorder %v340_v7, 10  ;;  %v268_v46 = vld [vmem:[%s502_s1 + $0x48] sm:$0x7f]  ;;  %v269_v49 = vld [vmem:[%s502_s1 + $0x50] sm:$0x7f] }
   0xe   :  { %v56_v32 = vsel %vm53_vm8, %v254_v17, %v52_v28  ;;  %v95_v38 = vsel %vm92_vm14, %v263_v27, %v91_v34  ;;  %vm104_vm4 = vcmp.eq.s32.totalorder %v351_v11, 7  ;;  %vm73_vm5 = vcmp.eq.s32.totalorder %v340_v7, 11  ;;  %v270_v52 = vld [vmem:[%s502_s1 + $0x58] sm:$0x7f]  ;;  %v271_v55 = vld [vmem:[%s502_s1 + $0x60] sm:$0x7f] }
   0xf   :  { %v60_v36 = vsel %vm57_vm9, %v255_v25, %v56_v32  ;;  %v99_v42 = vsel %vm96_vm0, %v264_v31, %v95_v38  ;;  %vm108_vm6 = vcmp.eq.s32.totalorder %v351_v11, 8  ;;  %vm112_vm7 = vcmp.eq.s32.totalorder %v351_v11, 9  ;;  %v272_v59 = vld [vmem:[%s502_s1 + $0x68] sm:$0x7f]  ;;  %v273_v62 = vld [vmem:[%s502_s1 + $0x70] sm:$0x7f] }
  0x10   :  { %v64_v40 = vsel %vm61_vm15, %v256_v29, %v60_v36  ;;  %v103_v45 = vsel %vm100_vm2, %v265_v35, %v99_v42  ;;  %vm116_vm8 = vcmp.eq.s32.totalorder %v351_v11, 10  ;;  %vm120_vm9 = vcmp.eq.s32.totalorder %v351_v11, 11  ;;  %v274_v0 = vld [vmem:[%s502_s1 + $0x78] sm:$0x7f] }
  0x11   :  { %v68_v44 = vsel %vm65_vm1, %v257_v33, %v64_v40  ;;  %v107_v48 = vsel %vm104_vm4, %v266_v39, %v103_v45  ;;  %vm124_vm10 = vcmp.eq.s32.totalorder %v351_v11, 12  ;;  %vm128_vm11 = vcmp.eq.s32.totalorder %v351_v11, 13  ;;  %v246_v40 = vld [vmem:[%s500_s2 + $0x10] sm:$0x7f] }
  0x12   :  { %v72_v47 = vsel %vm69_vm3, %v258_v37, %v68_v44  ;;  %v111_v51 = vsel %vm108_vm6, %v267_v43, %v107_v48  ;;  %vm132_vm12 = vcmp.eq.s32.totalorder %v351_v11, 14  ;;  %vm136_vm13 = vcmp.eq.s32.totalorder %v351_v11, 15 }
  0x13   :  { %v447_v50 = vsel %vm73_vm5, %v259_v41, %v72_v47  ;;  %v115_v54 = vsel %vm112_vm7, %v268_v46, %v111_v51  ;;  %v474_v5 = vshrl.u32 %v156_v53, 7  ;;  %vm158_vm14 = vcmp.gt.s32.totalorder %v334_v1, 0 }
  0x14   :  { %v275_v56 = vmul.f32 -1.442695, %v447_v50  ;;  %v174_v57 = vsub.f32 0.0, %v447_v50  ;;  %v119_v58 = vsel %vm116_vm8, %v269_v49, %v115_v54  ;;  %v186_v60 = vand.u32 2147483647, %v447_v50 }
  0x15   :  { %v123_v61 = vsel %vm120_vm9, %v270_v52, %v119_v58  ;;  %vm154_vm15 = vcmask 30720   ;;  %v159_v13 = vsel %vm158_vm14, %v474_v5, 4294967295  ;;  %v185_v38 = vmax.f32 %v447_v50, 0.0 }
  0x16   :  { %277 = vpow2.f32 %v275_v56  ;;  %v127_v63 = vsel %vm124_vm10, %v271_v55, %v123_v61  ;;  %v176_v2 = vand.u32 2147483647, %v174_v57  ;;  %v187_v3 = vsub.f32 0.0, %v186_v60 }
  0x17   :  { %v131_v4 = vsel %vm128_vm11, %v272_v59, %v127_v63  ;;  %v160_v1 = vsel %vm154_vm15, %v159_v13, 2147483648  ;;  %v175_v43 = vmax.f32 %v174_v57, 0.0  ;;  %v21_v45 = vcvt.s32.f32 %v246_v40 }
  0x18   :  { %v135_v6 = vsel %vm132_vm12, %v273_v62, %v131_v4  ;;  %v177_v7 = vsub.f32 0.0, %v176_v2  ;;  %v188_v8 = vmul.f32 1.442695, %v187_v3  ;;  %v161_v20 = vrot.slane %v160_v1, 4 }
  0x19   :  { %v477_v9 = vsel %vm136_vm13, %v274_v0, %v135_v6  ;;  %v196_v56 = vsub.f32 1.0, %v21_v45  ;;  %vm235_vm5 = vcmask 24576  }
  0x1a   :  { %v276_v10 = vmul.f32 -1.442695, %v477_v9  ;;  %v178_v11 = vmul.f32 1.442695, %v177_v7  ;;  %279 = vpow2.f32 %v188_v8  ;;  %v199_v12 = vsub.f32 0.0, %v477_v9 }
  0x1b   :  { %v211_v14 = vand.u32 2147483647, %v477_v9  ;;  %vm162_vm0 = vcmp.gt.s32.totalorder %v160_v1, %v161_v20  ;;  %v210_v53 = vmax.f32 %v477_v9, 0.0 }
  0x1c   :  { %281 = vpow2.f32 %v276_v10  ;;  %v201_v15 = vand.u32 2147483647, %v199_v12  ;;  %v163_v24 = vsel %vm162_vm0, %v160_v1, %v161_v20  ;;  %v200_v50 = vmax.f32 %v199_v12, 0.0 }
  0x1d   :  { %283 = vpow2.f32 %v178_v11  ;;  %v212_v16 = vsub.f32 0.0, %v211_v14  ;;  %v164_v29 = vrot.slane %v163_v24, 2 }
  0x1e   :  { %v202_v17 = vsub.f32 0.0, %v201_v15 }
  0x1f   :  { %v213_v18 = vmul.f32 1.442695, %v212_v16  ;;  %vm165_vm1 = vcmp.gt.s32.totalorder %v163_v24, %v164_v29 }
  0x20   :  { %v203_v19 = vmul.f32 1.442695, %v202_v17  ;;  %v166_v35 = vsel %vm165_vm1, %v163_v24, %v164_v29 }
  0x21   :  { %285 = vpow2.f32 %v213_v18  ;;  %v167_v36 = vrot.slane %v166_v35, 1 }
  0x22   :  { %287 = vpow2.f32 %v203_v19 }
  0x23   :  { %v278_v21 = vpop.eup %277  ;;  %vm168_vm2 = vcmp.gt.s32.totalorder %v166_v35, %v167_v36 }
  0x24   :  { %v143_v22 = vadd.f32 1.0, %v278_v21  ;;  %v169_v51 = vsel %vm168_vm2, %v166_v35, %v167_v36 }
  0x25   :  { %v171_v58 = vadd.s32 1, %v169_v51  ;;  %vm170_vm3 = vcmp.ge.s32.totalorder %v169_v51, 0 }
  0x26   :  { %289 = vrcp.f32 %v143_v22 }
  0x27   :  { %v280_v23 = vpop.eup %279  ;;  %v172_v3 = vsel %vm170_vm3, %v171_v58, 7 }
  0x28   :  { %v190_v25 = vadd.f32 1.0, %v280_v23  ;;  %v232_v10 = vcvt.s32.f32 %v172_v3  ;;  %vm173_vm4 = vcmp.lt.s32.totalorder %v474_v5, %v172_v3 }
  0x29   :  { %v282_v26 = vpop.eup %281 }
  0x2a   :  { %v284_v27 = vpop.eup %283  ;;  %v149_v28 = vadd.f32 1.0, %v282_v26  ;;  %291 = vlog2.f32 %v190_v25 }
  0x2b   :  { %v180_v30 = vadd.f32 1.0, %v284_v27 }
  0x2c   :  { %293 = vrcp.f32 %v149_v28 }
  0x2d   :  { %295 = vlog2.f32 %v180_v30 }
  0x2e   :  { %v286_v31 = vpop.eup %285 }
  0x2f   :  { %v288_v32 = vpop.eup %287  ;;  %v215_v33 = vadd.f32 1.0, %v286_v31 }
  0x30   :  { %v205_v34 = vadd.f32 1.0, %v288_v32 }
  0x31   :  { %297 = vlog2.f32 %v215_v33 }
  0x32   :  { %299 = vlog2.f32 %v205_v34 }
  0x33   :  { %v290_v37 = vpop.eup %289  ;;  %301 = vrcp.f32 %v232_v10 }
  0x37   :  { %v292_v39 = vpop.eup %291 }
  0x38   :  { %v192_v41 = vmul.f32 0.6931472, %v292_v39 }
  0x39   :  { %v294_v42 = vpop.eup %293 }
  0x3a   :  { %v296_v44 = vpop.eup %295  ;;  %v152_v46 = vadd.f32 %v294_v42, %v290_v37  ;;  %v193_v47 = vadd.f32 %v192_v41, %v185_v38 }
  0x3b   :  { %v182_v48 = vmul.f32 0.6931472, %v296_v44 }
  0x3c   :  { %v153_v49 = vmul.f32 0.5, %v152_v46  ;;  %v194_v55 = vmin.f32 %v193_v47, 100.0 }
  0x3d   :  { %v183_v52 = vadd.f32 %v182_v48, %v175_v43 }
  0x3e   :  { %v298_v54 = vpop.eup %297  ;;  %155 = vst.msk [vmem:[%s503_s3] sm:$0x7f] %vm154_vm15, %v153_v49  ;;  %v197_v0 = vmul.f32 %v196_v56, %v194_v55 }
  0x3f   :  { %v300_v57 = vpop.eup %299  ;;  %v184_v59 = vmin.f32 %v183_v52, 100.0  ;;  %v217_v60 = vmul.f32 0.6931472, %v298_v54 }
  0x40   :  { %v207_v61 = vmul.f32 0.6931472, %v300_v57  ;;  %v302_v19 = vpop.eup %301 }
  0x41   :  { %v218_v62 = vadd.f32 %v217_v60, %v210_v53  ;;  %v195_v63 = vmul.f32 %v184_v59, %v21_v45 }
  0x42   :  { %v208_v2 = vadd.f32 %v207_v61, %v200_v50 }
  0x43   :  { %v219_v4 = vmin.f32 %v218_v62, 100.0  ;;  %v198_v8 = vadd.f32 %v197_v0, %v195_v63 }
  0x44   :  { %v209_v6 = vmin.f32 %v208_v2, 100.0 }
  0x45   :  { %v221_v7 = vmul.f32 %v219_v4, %v196_v56 }
  0x46   :  { %v220_v9 = vmul.f32 %v209_v6, %v21_v45 }
  0x48   :  { %v222_v11 = vadd.f32 %v221_v7, %v220_v9 }
  0x4a   :  { %v223_v12 = vadd.f32 %v222_v11, %v198_v8 }
  0x4c   :  { %v224_v13 = vsel %vm173_vm4, %v223_v12, 0.0 }
  0x4d   :  { %v225_v14 = vsel %vm154_vm15, %v224_v13, 0.0 }
  0x4e   :  { %v226_v15 = vrot.slane %v225_v14, 4 }
  0x50   :  { %v227_v16 = vadd.f32 %v226_v15, %v225_v14 }
  0x52   :  { %v228_v1 = vrot.slane %v227_v16, 2 }
  0x54   :  { %v229_v17 = vadd.f32 %v228_v1, %v227_v16 }
  0x56   :  { %v230_v18 = vrot.slane %v229_v17, 1 }
  0x58   :  { %v231_v20 = vadd.f32 %v230_v18, %v229_v17 }
  0x5a   :  { %v234_v21 = vmul.f32 %v302_v19, %v231_v20 }
  0x5c   :  { %236 = vst.msk [vmem:[%s504_s4] sm:$0x1] %vm235_vm5, %v234_v21 }

</bundles_post_ra>
